<compile_context>
chip_gen: v6e
topology: v6e:2x2x1
jax: 0.10.0
libtpu: 0.0.40
codegen_flags: <defaults>
</compile_context>

<pallas_src>
from functools import partial

import jax
import jax.numpy as jnp
from jax.experimental import pallas as pl
from jax.experimental.pallas import tpu as pltpu

LANE = 128


def _round_up(x, m):
    return (x + m - 1) // m * m


def _cdiv(a, b):
    return -(-a // b)


def mlp_logsoftmax_kernel(x_ref, w1_ref, b1_ref, w2_ref, b2_ref, o_ref, *,
                          num_classes, compute_dtype):
    # x: (tb, D) f32, w1: (D, Hp) bf16, b1: (1, Hp) f32,
    # w2: (Hp, Cp) bf16, b2: (1, Cp) f32, o: (tb, num_classes) f32
    x = x_ref[...].astype(compute_dtype)   # in-kernel cast: VPU work hidden under DMA

    # Linear 1 (bf16 MXU, f32 accumulate) + bias + ReLU in f32.
    h = jnp.dot(x, w1_ref[...], preferred_element_type=jnp.float32) + b1_ref[...]
    h = jnp.maximum(h, 0.0)

    # Linear 2 (bf16 MXU, f32 accumulate) + bias in f32.
    logits = jnp.dot(h.astype(w2_ref.dtype), w2_ref[...],
                     preferred_element_type=jnp.float32) + b2_ref[...]

    # Mask zero-padded class lanes so they don't corrupt the softmax reduction.
    lane = jax.lax.broadcasted_iota(jnp.int32, logits.shape, dimension=1)
    logits = jnp.where(lane < num_classes, logits, -jnp.inf)

    # Numerically stable LogSoftmax over dim=1 (f32; exp/log go to the EUP).
    m = jnp.max(logits, axis=1, keepdims=True)
    z = logits - m
    lse = jnp.log(jnp.sum(jnp.exp(z), axis=1, keepdims=True))
    logp = z - lse

    # Store only the real classes. The masked narrow vst is tiny next to the
    # HBM DMA saved by not writing the 128-lane padded slab.
    o_ref[...] = logp[:, :num_classes].astype(o_ref.dtype)


def prepare_params(w1, b1, w2, b2, compute_dtype=jnp.bfloat16):
    """One-time param prep: transpose to (in, out), zero-pad H and C to 128 lanes.

    PyTorch layout in: w1 (H, D), b1 (H,), w2 (C, H), b2 (C,).
    """
    H, D = w1.shape
    C = w2.shape[0]
    H_pad = _round_up(H, LANE)
    C_pad = _round_up(C, LANE)

    w1_t = jnp.zeros((D, H_pad), compute_dtype).at[:, :H].set(
        jnp.transpose(w1).astype(compute_dtype))
    b1_p = jnp.zeros((1, H_pad), jnp.float32).at[:, :H].set(b1.astype(jnp.float32))
    w2_t = jnp.zeros((H_pad, C_pad), compute_dtype).at[:H, :C].set(
        jnp.transpose(w2).astype(compute_dtype))
    b2_p = jnp.zeros((1, C_pad), jnp.float32).at[:, :C].set(b2.astype(jnp.float32))
    return w1_t, b1_p, w2_t, b2_p


def _choose_batch_tile(B, block_rows):
    """Batch tile: minimize tail padding, round to 16, >=2 steps for big batches."""
    # >=2 grid steps when the batch is big enough so ("parallel",) can shard
    # the grid across v7x's two TensorCores.
    min_steps = 2 if B >= 1024 else 1
    n_steps = max(_cdiv(B, block_rows), min_steps)
    tb = _round_up(_cdiv(B, n_steps), 16)
    # Don't exceed the (8-rounded) batch; keeps tail over-read small.
    return min(tb, _round_up(B, 8))


@partial(jax.jit, static_argnames=("num_classes", "block_rows", "compute_dtype"))
def neural_net_forward(x, w1_t, b1_p, w2_t, b2_p, *, num_classes,
                       block_rows=4096, compute_dtype=jnp.bfloat16):
    """x: (B, D) float32; prepared params from prepare_params.

    Returns log-probabilities of shape (B, num_classes), matching NeuralNet.forward.
    """
    B, D = x.shape
    H_pad = w1_t.shape[1]
    C_pad = w2_t.shape[1]

    tb = _choose_batch_tile(B, block_rows)
    grid = (pl.cdiv(B, tb),)

    itemsize = jnp.dtype(compute_dtype).itemsize
    flops = 2 * B * (D * H_pad + H_pad * C_pad)
    bytes_accessed = (
        B * D * 4                                         # x stream (f32 read)
        + (w1_t.size + w2_t.size) * itemsize              # weights (bf16, resident)
        + (b1_p.size + b2_p.size) * 4                     # biases (f32, resident)
        + B * num_classes * 4                             # output stream (f32)
    )

    out = pl.pallas_call(
        partial(mlp_logsoftmax_kernel, num_classes=num_classes,
                compute_dtype=compute_dtype),
        out_shape=jax.ShapeDtypeStruct((B, num_classes), jnp.float32),
        grid=grid,
        in_specs=[
            pl.BlockSpec((tb, D), lambda i: (i, 0)),        # x: streamed per tile
            pl.BlockSpec((D, H_pad), lambda i: (0, 0)),     # w1: VMEM-resident
            pl.BlockSpec((1, H_pad), lambda i: (0, 0)),     # b1: VMEM-resident
            pl.BlockSpec((H_pad, C_pad), lambda i: (0, 0)), # w2: VMEM-resident
            pl.BlockSpec((1, C_pad), lambda i: (0, 0)),     # b2: VMEM-resident
        ],
        out_specs=pl.BlockSpec((tb, num_classes), lambda i: (i, 0)),
        compiler_params=pltpu.CompilerParams(
            dimension_semantics=("parallel",),
        ),
        cost_estimate=pl.CostEstimate(
            flops=flops,
            transcendentals=B * (C_pad + 1),
            bytes_accessed=bytes_accessed,
        ),
    )(x, w1_t, b1_p, w2_t, b2_p)

    return out


def init_params(key, input_size, hidden_size, num_classes):
    """Deterministic init mirroring nn.Linear's U(-1/sqrt(fan_in), 1/sqrt(fan_in))."""
    k1, k2, k3, k4 = jax.random.split(key, 4)
    bound1 = 1.0 / jnp.sqrt(jnp.float32(input_size))
    bound2 = 1.0 / jnp.sqrt(jnp.float32(hidden_size))
    w1 = jax.random.uniform(k1, (hidden_size, input_size), jnp.float32, -bound1, bound1)
    b1 = jax.random.uniform(k2, (hidden_size,), jnp.float32, -bound1, bound1)
    w2 = jax.random.uniform(k3, (num_classes, hidden_size), jnp.float32, -bound2, bound2)
    b2 = jax.random.uniform(k4, (num_classes,), jnp.float32, -bound2, bound2)
    return w1, b1, w2, b2


def _reference(x, w1, b1, w2, b2):
    h = jnp.maximum(x @ w1.T + b1, 0.0)
    return jax.nn.log_softmax(h @ w2.T + b2, axis=1)


if __name__ == "__main__":
    # Small shapes consistent with the module: tabular input, 2-class output.
    input_size = 32       # stands in for X_train.shape[1]
    hidden_size = 100     # as in the reference module
    num_classes = 2

    key = jax.random.PRNGKey(0)
    k_x, k_x2, k_p = jax.random.split(key, 3)
    w1, b1, w2, b2 = init_params(k_p, input_size, hidden_size, num_classes)

    # One-time parameter preparation (transpose + lane-pad + bf16 cast).
    w1_t, b1_p, w2_t, b2_p = prepare_params(w1, b1, w2, b2)

    # Case 1: batch multiple of 8 (exact tiles).
    x = jax.random.normal(k_x, (8, input_size), dtype=jnp.float32)
    out = jax.block_until_ready(
        neural_net_forward(x, w1_t, b1_p, w2_t, b2_p, num_classes=num_classes))
    ref = _reference(x, w1, b1, w2, b2)
    assert out.shape == (8, num_classes)
    assert jnp.allclose(out, ref, atol=2e-2, rtol=2e-2)

    # Case 2: ragged batch (exercises the masked tail tile / OOB-masked output rows).
    x2 = jax.random.normal(k_x2, (50, input_size), dtype=jnp.float32)
    out2 = jax.block_until_ready(
        neural_net_forward(x2, w1_t, b1_p, w2_t, b2_p, num_classes=num_classes))
    ref2 = _reference(x2, w1, b1, w2, b2)
    assert out2.shape == (50, num_classes)
    assert jnp.allclose(out2, ref2, atol=2e-2, rtol=2e-2)

    print("KERNEL_OK")
</pallas_src>

<mosaic_0001>
module attributes {stable_mosaic.version = 11 : i64} {
  func.func @mlp_logsoftmax_kernel(%arg0: i32, %arg1: memref<8x32xf32, #tpu.memory_space<vmem>>, %arg2: memref<32x128xbf16, #tpu.memory_space<vmem>>, %arg3: memref<1x128xf32, #tpu.memory_space<vmem>>, %arg4: memref<128x128xbf16, #tpu.memory_space<vmem>>, %arg5: memref<1x128xf32, #tpu.memory_space<vmem>>, %arg6: memref<8x2xf32, #tpu.memory_space<vmem>>) attributes {dimension_semantics = [#tpu.dimension_semantics<parallel>], iteration_bounds = array<i64: 1>, scalar_prefetch = 0 : i64, scratch_operands = 0 : i64, tpu.core_type = #tpu.core_type<tc>, window_params = [{transform_indices = @transform_0, window_bounds = array<i64: 8, 32>}, {pipeline_mode = #tpu.pipeline_mode<synchronous>, transform_indices = @transform_1, window_bounds = array<i64: 32, 128>}, {pipeline_mode = #tpu.pipeline_mode<synchronous>, transform_indices = @transform_2, window_bounds = array<i64: 1, 128>}, {pipeline_mode = #tpu.pipeline_mode<synchronous>, transform_indices = @transform_3, window_bounds = array<i64: 128, 128>}, {pipeline_mode = #tpu.pipeline_mode<synchronous>, transform_indices = @transform_4, window_bounds = array<i64: 1, 128>}, {transform_indices = @transform_5, window_bounds = array<i64: 8, 2>}]} {
    %c0 = arith.constant 0 : index
    %c0_0 = arith.constant 0 : index
    %0 = vector.load %arg1[%c0, %c0_0] : memref<8x32xf32, #tpu.memory_space<vmem>>, vector<8x32xf32>
    %1 = arith.truncf %0 : vector<8x32xf32> to vector<8x32xbf16>
    %c0_1 = arith.constant 0 : index
    %c0_2 = arith.constant 0 : index
    %2 = vector.load %arg2[%c0_1, %c0_2] : memref<32x128xbf16, #tpu.memory_space<vmem>>, vector<32x128xbf16>
    %cst = arith.constant dense<0.000000e+00> : vector<8x128xf32>
    %3 = tpu.matmul %1, %2, %cst {dimension_numbers = #tpu.dot_dimension_numbers<[1], [0], [0], [1], [0, 0, 1, 1], [], []>} : vector<8x32xbf16>, vector<32x128xbf16>, vector<8x128xf32> -> vector<8x128xf32>
    %c0_3 = arith.constant 0 : index
    %c0_4 = arith.constant 0 : index
    %4 = vector.load %arg3[%c0_3, %c0_4] : memref<1x128xf32, #tpu.memory_space<vmem>>, vector<1x128xf32>
    %5 = vector.broadcast %4 : vector<1x128xf32> to vector<8x128xf32>
    %6 = arith.addf %3, %5 : vector<8x128xf32>
    %cst_5 = arith.constant 0.000000e+00 : f32
    %7 = vector.broadcast %cst_5 : f32 to vector<8x128xf32>
    %8 = arith.maximumf %6, %7 : vector<8x128xf32>
    %9 = arith.truncf %8 : vector<8x128xf32> to vector<8x128xbf16>
    %c0_6 = arith.constant 0 : index
    %c0_7 = arith.constant 0 : index
    %10 = vector.load %arg4[%c0_6, %c0_7] : memref<128x128xbf16, #tpu.memory_space<vmem>>, vector<128x128xbf16>
    %cst_8 = arith.constant dense<0.000000e+00> : vector<8x128xf32>
    %11 = tpu.matmul %9, %10, %cst_8 {dimension_numbers = #tpu.dot_dimension_numbers<[1], [0], [0], [1], [0, 0, 1, 1], [], []>} : vector<8x128xbf16>, vector<128x128xbf16>, vector<8x128xf32> -> vector<8x128xf32>
    %c0_9 = arith.constant 0 : index
    %c0_10 = arith.constant 0 : index
    %12 = vector.load %arg5[%c0_9, %c0_10] : memref<1x128xf32, #tpu.memory_space<vmem>>, vector<1x128xf32>
    %13 = vector.broadcast %12 : vector<1x128xf32> to vector<8x128xf32>
    %14 = arith.addf %11, %13 : vector<8x128xf32>
    %15 = tpu.iota {dimensions = array<i32: 1>} : vector<8x128xi32>
    %c2_i32 = arith.constant 2 : i32
    %16 = vector.broadcast %c2_i32 : i32 to vector<8x128xi32>
    %17 = arith.cmpi slt, %15, %16 : vector<8x128xi32>
    %cst_11 = arith.constant 0xFF800000 : f32
    %18 = vector.broadcast %cst_11 : f32 to vector<8x128xf32>
    %19 = arith.select %17, %14, %18 : vector<8x128xi1>, vector<8x128xf32>
    %cst_12 = arith.constant dense<0xFF800000> : vector<8xf32>
    %20 = vector.multi_reduction <maximumf>, %19, %cst_12 [1] : vector<8x128xf32> to vector<8xf32>
    %21 = vector.shape_cast %20 : vector<8xf32> to vector<8x1xf32>
    %22 = vector.broadcast %21 : vector<8x1xf32> to vector<8x128xf32>
    %23 = arith.subf %19, %22 : vector<8x128xf32>
    %24 = math.exp %23 : vector<8x128xf32>
    %cst_13 = arith.constant dense<0.000000e+00> : vector<8xf32>
    %25 = vector.multi_reduction <add>, %24, %cst_13 [1] : vector<8x128xf32> to vector<8xf32>
    %26 = vector.shape_cast %25 : vector<8xf32> to vector<8x1xf32>
    %27 = math.log %26 : vector<8x1xf32>
    %28 = vector.broadcast %27 : vector<8x1xf32> to vector<8x128xf32>
    %29 = arith.subf %23, %28 : vector<8x128xf32>
    %30 = vector.extract_strided_slice %29 {offsets = [0, 0], sizes = [8, 2], strides = [1, 1]} : vector<8x128xf32> to vector<8x2xf32>
    %c0_14 = arith.constant 0 : index
    %c0_15 = arith.constant 0 : index
    %31 = vector.load %arg6[%c0_14, %c0_15] : memref<8x2xf32, #tpu.memory_space<vmem>>, vector<8x2xf32>
    tpu.vector_store %arg6[%c0_14, %c0_15], %30 {strides = array<i32>} : memref<8x2xf32, #tpu.memory_space<vmem>>, vector<8x2xf32>,
    return
  }
  func.func @transform_0(%arg0: i32) -> (i32, i32) {
    %c0_i32 = arith.constant 0 : i32
    %c0_i32_0 = arith.constant 0 : i32
    return %arg0, %c0_i32 : i32, i32
  }
  func.func @transform_1(%arg0: i32) -> (i32, i32) {
    %c0_i32 = arith.constant 0 : i32
    %c0_i32_0 = arith.constant 0 : i32
    %c0_i32_1 = arith.constant 0 : i32
    return %c0_i32, %c0_i32_0 : i32, i32
  }
  func.func @transform_2(%arg0: i32) -> (i32, i32) {
    %c0_i32 = arith.constant 0 : i32
    %c0_i32_0 = arith.constant 0 : i32
    %c0_i32_1 = arith.constant 0 : i32
    return %c0_i32, %c0_i32_0 : i32, i32
  }
  func.func @transform_3(%arg0: i32) -> (i32, i32) {
    %c0_i32 = arith.constant 0 : i32
    %c0_i32_0 = arith.constant 0 : i32
    %c0_i32_1 = arith.constant 0 : i32
    return %c0_i32, %c0_i32_0 : i32, i32
  }
  func.func @transform_4(%arg0: i32) -> (i32, i32) {
    %c0_i32 = arith.constant 0 : i32
    %c0_i32_0 = arith.constant 0 : i32
    %c0_i32_1 = arith.constant 0 : i32
    return %c0_i32, %c0_i32_0 : i32, i32
  }
  func.func @transform_5(%arg0: i32) -> (i32, i32) {
    %c0_i32 = arith.constant 0 : i32
    %c0_i32_0 = arith.constant 0 : i32
    return %arg0, %c0_i32 : i32, i32
  }
}

</mosaic_0001>

<bundles_post_ra>
// kernel: neural_net_forward.1
= control target key start
LH: loop header
LB: loop body
LE: loop exit
PB: predicated region body
PF: predicated region fallthrough
CT: control target
= control target key end

     0   :  { %10 = vsyncpa [#allocation3], 0  ;;  %s457_s0 = inlined_call_operand.hbm [shape: f32[8,32], index: 0, kind: input, shape index: {}]   ;;  %s458_s1 = inlined_call_operand.hbm [shape: bf16[32,128], index: 1, kind: input, shape index: {}]   ;;  %s459_s2 = inlined_call_operand.vmem [shape: f32[1,128], index: 2, kind: input, shape index: {}]   ;;  %s460_s3 = inlined_call_operand.hbm [shape: bf16[128,128], index: 3, kind: input, shape index: {}]   ;;  %s461_s4 = inlined_call_operand.vmem [shape: f32[1,128], index: 4, kind: input, shape index: {}]   ;;  %s462_s5 = inlined_call_operand.vmem [shape: f32[8,2], index: 5, kind: output, shape index: {}]  }
   0x1   :  { %11 = vsyncpa [#allocation5], 0  ;;  %s402_s18 = smov [#allocation4]  }
   0x2   :  { %s27_s19 = sshll.u32 %s402_s18, 4  ;;  %s28_s19 = int_to_ptr.vmem [resolvable:$true] %s27_s19 }
   0x3   :  { %s346_s20 = scalar_lea.vmem %s28_s19, 256  ;;  %p351_p1 = scmp.lt.s32.totalorder %s28_s19, %s28_s19 }
   0x4   :  { %p347_p0 = scmp.ne.s32.totalorder %s28_s19, %s346_s20  ;;  %p352_p2 = scmp.lt.s32.totalorder %s346_s20, %s346_s20 }
   0x6   :  { %p353_p3 = por %p352_p2, %p351_p1 }
   0x8   :  { %p354_p4 = pnand %p353_p3, %p347_p0 }
   0xa   :  { %357 = shalt.err (!%p354_p4)
}
   0xb   :  { %s403_s21 = smov 64   ;;  %s404_s22 = smov 4  }
   0xc   :  { %33 = dma.hbm_to_vmem [thread:$0]  %s458_s1, 256, %s28_s19, [#allocation5], %s403_s21, %s403_s21, %s404_s22  }
   0xd   :  { %s405_s25 = smov [#allocation2]   ;;  %s406_s27 = smov [#allocation6]  }
   0xe   :  { %s18_s26 = sshll.u32 %s405_s25, 4  ;;  %s41_s28 = sshll.u32 %s406_s27, 4  ;;  %s19_s26 = int_to_ptr.vmem [resolvable:$true] %s18_s26  ;;  %s42_s28 = int_to_ptr.vmem [resolvable:$true] %s41_s28 }
   0xf   :  { %s366_s29 = scalar_lea.vmem %s19_s26, 128  ;;  %p371_p6 = scmp.lt.s32.totalorder %s19_s26, %s19_s26 }
  0x10   :  { %p367_p5 = scmp.ne.s32.totalorder %s19_s26, %s366_s29  ;;  %p372_p7 = scmp.lt.s32.totalorder %s366_s29, %s366_s29 }
  0x12   :  { %p373_p8 = por %p372_p7, %p371_p6 }
  0x14   :  { %p374_p9 = pnand %p373_p8, %p367_p5 }
  0x16   :  { %377 = shalt.err (!%p374_p9)
}
  0x17   :  { %21 = dma.hbm_to_vmem [thread:$0]  %s457_s0, 128, %s19_s26, [#allocation3]  }
  0x18   :  { %s386_s7 = scalar_lea.vmem %s42_s28, 1024  ;;  %p391_p11 = scmp.lt.s32.totalorder %s42_s28, %s42_s28 }
  0x19   :  { %p387_p10 = scmp.ne.s32.totalorder %s42_s28, %s386_s7  ;;  %p392_p12 = scmp.lt.s32.totalorder %s386_s7, %s386_s7 }
  0x1b   :  { %p393_p13 = por %p392_p12, %p391_p11 }
  0x1d   :  { %p394_p0 = pnand %p393_p13, %p387_p10 }
  0x1f   :  { %397 = shalt.err (!%p394_p0)
}
  0x20   :  { %47 = dma.hbm_to_vmem [thread:$0]  %s460_s3, 1024, %s42_s28, [#allocation5], %s403_s21, %s403_s21, %s404_s22  }
  0x21   :  { %398 = dma.done.wait [#allocation3], 128  }
  0x22   :  { %399 = vsyncadd [#allocation3], 4294967168 }
  0x23   :  { %400 = dma.done.wait [#allocation5], 1280  }
  0x24   :  { %401 = vsyncadd [#allocation5], 4294966016  ;;  %v407_v0 = vmov 0.0   ;;  %vm408_vm0 = vmmov 0   ;;  %v324_v1 = vld [vmem:[#allocation4 + $0x8] sm:$0xff]   ;;  %v325_v2 = vld [vmem:[#allocation4] sm:$0xff]   ;;  %v242_v21 = vlaneseq }
  0x25   :  { %289 = vmatprep.subr.bf16.mxu0 %v407_v0  ;;  %293 = vmatprep.mubr.msk.bf16.mxu0 %vm408_vm0, %v407_v0  ;;  %v60_v3 = vld [vmem:[#allocation2] sm:$0xff]  ;;  %v326_v4 = vld [vmem:[#allocation6 + $0x38] sm:$0xff]   ;;  %v327_v6 = vld [vmem:[#allocation6 + $0x30] sm:$0xff]   ;;  %vm85_vm1 = vcmask 261120   ;;  %vm256_vm3 = vcmask 15360  }
  0x26   :  { %297 = vmatprep.subr.bf16.mxu1 %v407_v0  ;;  %313 = vmatprep.mubr.msk.bf16.mxu1 %vm408_vm0, %v407_v0  ;;  %v61_v5 = vpack.c.bf16 %v60_v3, %v60_v3  ;;  %v328_v7 = vld [vmem:[#allocation6 + $0x28] sm:$0xff]   ;;  %v329_v8 = vld [vmem:[#allocation6 + $0x20] sm:$0xff]   ;;  %v330_v9 = vld [vmem:[#allocation6 + $0x18] sm:$0xff]   ;;  %v243_v22 = vand.u32 127, %v242_v21 }
  0x27   :  { %290 = vmatpush3.bf16.msra.mxu0 %v324_v1  ;;  %298 = vmatpush3.bf16.msra.mxu1 %v326_v4  ;;  %v331_v10 = vld [vmem:[#allocation6 + $0x10] sm:$0xff]   ;;  %v332_v11 = vld [vmem:[#allocation6 + $0x8] sm:$0xff]   ;;  %v333_v12 = vld [vmem:[#allocation6] sm:$0xff]  }
  0x28   :  { %291 = vmatprep.subr.bf16.mxu0 %v407_v0  ;;  %299 = vmatprep.subr.bf16.mxu1 %v407_v0  ;;  %v264_v13 = vld [vmem:[%s459_s2] ss:$0 sm:$0xff]  ;;  %vm244_vm2 = vcmp.lt.s32.totalorder %v243_v22, 2 }
  0x29   :  { %v268_v23 = vld [vmem:[%s461_s4] ss:$0 sm:$0xff] }
  0x2b   :  { %292 = vmatpush3.bf16.msra.mxu0 %v325_v2  ;;  %300 = vmatpush3.bf16.msra.mxu1 %v327_v6 }
  0x2c   :  { %301 = vmatprep.subr.bf16.mxu1 %v407_v0 }
  0x2e   :  { %294 = vmatmul.mubr.msk.bf16.vlgmr.msra.gmra.mxu0 %vm85_vm1, %v61_v5 }
  0x2f   :  { %302 = vmatpush3.bf16.msra.mxu1 %v328_v7 }
  0x30   :  { %303 = vmatprep.subr.bf16.mxu1 %v407_v0 }
  0x33   :  { %304 = vmatpush3.bf16.msra.mxu1 %v329_v8 }
  0x34   :  { %305 = vmatprep.subr.bf16.mxu1 %v407_v0 }
  0x37   :  { %306 = vmatpush3.bf16.msra.mxu1 %v330_v9 }
  0x38   :  { %307 = vmatprep.subr.bf16.mxu1 %v407_v0 }
  0x3b   :  { %308 = vmatpush3.bf16.msra.mxu1 %v331_v10 }
  0x3c   :  { %309 = vmatprep.subr.bf16.mxu1 %v407_v0 }
  0x3f   :  { %310 = vmatpush3.bf16.msra.mxu1 %v332_v11 }
  0x40   :  { %311 = vmatprep.subr.bf16.mxu1 %v407_v0 }
  0x43   :  { %312 = vmatpush3.bf16.msra.mxu1 %v333_v12 }
  0xee   :  { %v123_v14 = vpop.f32.mrf.mxu0 }
  0xef   :  { %v124_v15 = vadd.f32 %v264_v13, %v123_v14 }
  0xf0   :  { %v295_v16 = vpop.f32.mrf.mxu0 }
  0xf1   :  { %v129_v17 = vmax.f32 %v124_v15, 0.0 }
  0xf2   :  { %v126_v18 = vpop.f32.mrf.mxu0 }
  0xf3   :  { %v130_v19 = vpack.c.bf16 %v129_v17, %v129_v17 }
  0xf4   :  { %v296_v20 = vpop.f32.mrf.mxu0 }
  0xf5   :  { %314 = vmatmul.mubr.bf16.vlgmr.msra.gmra.mxu1 %v130_v19 }
 0x1b5   :  { %v236_v24 = vpop.f32.mrf.mxu1 }
 0x1b6   :  { %v237_v25 = vadd.f32 %v268_v23, %v236_v24 }
 0x1b7   :  { %v315_v26 = vpop.f32.mrf.mxu1 }
 0x1b8   :  { %v245_v27 = vsel %vm244_vm2, %v237_v25, -inf }
 0x1b9   :  { %246 = vmax.xlane.f32.xlu0 %v245_v27  ;;  %v239_v28 = vpop.f32.mrf.mxu1 }
 0x1bb   :  { %v316_v29 = vpop.f32.mrf.mxu1 }
 0x242   :  { %v247_v30 = vpop.xlane.xlu0 %246 }
 0x243   :  { %v248_v31 = vsub.f32 %v245_v27, %v247_v30 }
 0x245   :  { %v249_v32 = vmul.f32 1.442695, %v248_v31 }
 0x247   :  { %334 = vpow2.f32 %v249_v32 }
 0x254   :  { %v335_v33 = vpop.eup %334 }
 0x255   :  { %251 = vadd.xlane.f32.xlu0 %v335_v33 }
 0x2de   :  { %v252_v34 = vpop.xlane.xlu0 %251 }
 0x2df   :  { %336 = vlog2.f32 %v252_v34 }
 0x2ec   :  { %v337_v35 = vpop.eup %336 }
 0x2ed   :  { %v254_v36 = vmul.f32 0.6931472, %v337_v35 }
 0x2ef   :  { %v255_v37 = vsub.f32 %v248_v31, %v254_v36 }
 0x2f1   :  { %257 = vst.msk [vmem:[%s462_s5] sm:$0xff] %vm256_vm3, %v255_v37 }
 0x2f2   :  { %262 = vsyncpa [#allocation3], 1 }
 0x2f3   :  { %263 = vsyncpa [#allocation5], 1 }

</bundles_post_ra>
